<compile_context>
chip_gen: v5e
topology: v5e:2x2
jax: 0.10.0
libtpu: 0.0.40
codegen_flags: <defaults>
</compile_context>

<pallas_src>
from functools import partial

import jax
import jax.numpy as jnp
from jax.experimental import pallas as pl
from jax.experimental.pallas import tpu as pltpu

_LANES = 128
_SUBLANES = 8
_MAX_TILE_ROWS = 8192  # 4 MiB/tile; x2 double-buffered = 8 MiB < 16 MiB v5e scoped VMEM


def _round_up(v: int, m: int) -> int:
    return ((v + m - 1) // m) * m


def _single_variance_fill_kernel(var_ref, o_ref):
    # var_ref: SMEM scalar, shape (1,) — the raw learnable `variance`
    # o_ref:   VMEM output tile, shape (TILE_ROWS, 128)
    inv_s = jnp.exp(var_ref[0] * 10.0)          # scalar/EUP path, once per step
    o_ref[...] = jnp.full(o_ref.shape, inv_s, o_ref.dtype)


@partial(jax.jit, static_argnames=("tile_rows",))
def single_variance_forward(x, variance, *, tile_rows: int = 4096):
    """Pallas implementation of SingleVarianceNetwork.forward.

    Args:
      x: (N, D) array — only its leading dim is used (matches `len(x)`).
      variance: scalar parameter (the learnable `variance`).
      tile_rows: rows-of-128-lanes per grid step (multiple of 8).

    Returns:
      (N, 1) float32 array filled with exp(variance * 10.0).
    """
    n = x.shape[0]
    var_arr = jnp.reshape(jnp.asarray(variance, dtype=jnp.float32), (1,))

    if n == 0:
        return jnp.zeros((0, 1), dtype=jnp.float32)

    # Lane-dense slab layout: rows of 128 lanes, sublane-aligned (multiple of 8).
    rows_needed = pl.cdiv(n, _LANES)
    rows_aligned = _round_up(rows_needed, _SUBLANES)

    # Tile rows: multiple of 8, capped for VMEM, never larger than the slab.
    tr = min(_round_up(max(tile_rows, _SUBLANES), _SUBLANES),
             _MAX_TILE_ROWS, rows_aligned)
    # v7x: ensure >= 2 grid steps when the slab spans >= 2 sublane groups so the
    # "parallel" axis actually splits the fill across both TensorCores.
    if rows_aligned >= 2 * _SUBLANES:
        half = _round_up((rows_aligned + 1) // 2, _SUBLANES)
        tr = min(tr, half)

    grid_steps = pl.cdiv(rows_aligned, tr)  # partial last block handled by Pallas

    slab = pl.pallas_call(
        _single_variance_fill_kernel,
        out_shape=jax.ShapeDtypeStruct((rows_aligned, _LANES), jnp.float32),
        grid=(grid_steps,),
        in_specs=[pl.BlockSpec(memory_space=pltpu.SMEM)],   # scalar param in SMEM
        out_specs=pl.BlockSpec((tr, _LANES), lambda i: (i, 0)),
        compiler_params=pltpu.CompilerParams(
            dimension_semantics=("parallel",),               # shard fill across TCs (v7x)
        ),
        cost_estimate=pl.CostEstimate(
            flops=0,
            transcendentals=grid_steps,
            bytes_accessed=rows_aligned * _LANES * 4 + 4,
        ),
    )(var_arr)

    # Exactly (N, 1); under jit this reshape/slice fuses into the consumer, so
    # padded rows never leak and no extra standalone HBM round trip is emitted.
    return slab.reshape(-1, 1)[:n]


if __name__ == "__main__":
    key = jax.random.PRNGKey(0)

    # Deterministic parameter init, mirroring __init__(init_val)
    init_val = 0.3
    variance = jnp.asarray(init_val, dtype=jnp.float32)
    inv_s_ref = jnp.exp(variance * 10.0)

    # Small example input: 8 points with 3 coordinates (only len(x) matters)
    x = jax.random.normal(key, (8, 3), dtype=jnp.float32)
    out = jax.block_until_ready(single_variance_forward(x, variance))
    ref = jnp.ones((x.shape[0], 1), dtype=jnp.float32) * inv_s_ref
    assert out.shape == (8, 1), out.shape
    assert out.dtype == jnp.float32, out.dtype
    assert jnp.allclose(out, ref, rtol=1e-6, atol=1e-6), (out, ref)

    # Partial-lane case (N not a multiple of 128): exercises the [:n] slice.
    x_mid = jax.random.normal(key, (300, 3), dtype=jnp.float32)
    out_mid = jax.block_until_ready(single_variance_forward(x_mid, variance))
    ref_mid = jnp.ones((300, 1), dtype=jnp.float32) * inv_s_ref
    assert out_mid.shape == (300, 1), out_mid.shape
    assert jnp.allclose(out_mid, ref_mid, rtol=1e-6, atol=1e-6)

    # Multi-step grid case (rows_aligned >= 16 -> grid of 2 parallel steps).
    x_big = jax.random.normal(key, (2048, 3), dtype=jnp.float32)
    out_big = jax.block_until_ready(single_variance_forward(x_big, variance))
    ref_big = jnp.ones((2048, 1), dtype=jnp.float32) * inv_s_ref
    assert out_big.shape == (2048, 1), out_big.shape
    assert jnp.allclose(out_big, ref_big, rtol=1e-6, atol=1e-6)

    print("KERNEL_OK")
</pallas_src>

<mosaic_0001>
module attributes {stable_mosaic.version = 11 : i64} {
  func.func @_single_variance_fill_kernel(%arg0: i32, %arg1: memref<1xf32, #tpu.memory_space<smem>>, %arg2: memref<8x128xf32, #tpu.memory_space<vmem>>) attributes {dimension_semantics = [#tpu.dimension_semantics<parallel>], iteration_bounds = array<i64: 1>, scalar_prefetch = 0 : i64, scratch_operands = 0 : i64, tpu.core_type = #tpu.core_type<tc>, window_params = [{transform_indices = @transform_0, window_bounds = array<i64: 1>}, {transform_indices = @transform_1, window_bounds = array<i64: 8, 128>}]} {
    %c0 = arith.constant 0 : index
    %0 = memref.load %arg1[%c0] : memref<1xf32, #tpu.memory_space<smem>>
    %cst = arith.constant 1.000000e+01 : f32
    %1 = arith.mulf %0, %cst : f32
    %2 = math.exp %1 : f32
    %3 = vector.broadcast %2 : f32 to vector<8x128xf32>
    %c0_0 = arith.constant 0 : index
    %c0_1 = arith.constant 0 : index
    %4 = vector.load %arg2[%c0_0, %c0_1] : memref<8x128xf32, #tpu.memory_space<vmem>>, vector<8x128xf32>
    tpu.vector_store %arg2[%c0_0, %c0_1], %3 {strides = array<i32>} : memref<8x128xf32, #tpu.memory_space<vmem>>, vector<8x128xf32>,
    return
  }
  func.func @transform_0(%arg0: i32) -> i32 {
    %c0_i32 = arith.constant 0 : i32
    %c0_i32_0 = arith.constant 0 : i32
    return %c0_i32 : i32
  }
  func.func @transform_1(%arg0: i32) -> (i32, i32) {
    %c0_i32 = arith.constant 0 : i32
    %c0_i32_0 = arith.constant 0 : i32
    return %arg0, %c0_i32 : i32, i32
  }
}

</mosaic_0001>

<bundles_post_ra>
// kernel: single_variance_forward.1
= control target key start
LH: loop header
LB: loop body
LE: loop exit
PB: predicated region body
PF: predicated region fallthrough
CT: control target
= control target key end

     0   :  { %s41_s0 = inlined_call_operand.<no memory space> [shape: f32[1], index: 0, kind: input, shape index: {}]   ;;  %s42_s1 = inlined_call_operand.vmem [shape: f32[8,128], index: 1, kind: output, shape index: {}]  }
   0x1   :  { %s10_s8 = smul.f32 10.0, %s41_s0 }
   0x3   :  { %v11_v0 = vstv %s10_s8 }
   0x4   :  { %v12_v1 = vmul.f32 1.442695, %v11_v0 }
   0x6   :  { %23 = vpow2.f32 %v12_v1 }
   0xc   :  { %v24_v2 = vpop.eup %23 }
   0xd   :  { %21 = vpush %v24_v2 }
  0x3e   :  { %s22_s9 = spop %21 }
  0x3f   :  { %v15_v3 = vstv %s22_s9 }
  0x40   :  { %16 = vst [vmem:[%s42_s1] sm:$0xff] %v15_v3 }

</bundles_post_ra>
